<compile_context>
chip_gen: v7x
topology: tpu7x:2x2x1
jax: 0.10.0
libtpu: 0.0.40
codegen_flags: <defaults>
</compile_context>

<pallas_src>
import numpy as np
import jax
import jax.numpy as jnp
from jax import lax
from jax.experimental import pallas as pl
from jax.experimental.pallas import tpu as pltpu


# ----------------------------- Fused kernel -----------------------------
def _make_fused_kernel(n_head: int, ratio: float):
    n_head_f = float(n_head)
    ratio_f = float(ratio)

    def kernel(n_src_ref, ns_tgt_ref, emb_ref, wa_ref, out_ref):
        b = pl.program_id(0)
        ns = n_src_ref[b]                    # int32 scalar (SMEM, scalar-prefetched)
        nt = ns_tgt_ref[b]                   # int32 scalar (SMEM)
        N = out_ref.shape[1]

        # ---- fused projection (MXU): a12 = emb_b @ (W^T [a1|a2]) -> (N, 2) ----
        emb = emb_ref[0]                                           # (N, Fin)
        a12 = jnp.dot(emb, wa_ref[...], preferred_element_type=jnp.float32)
        a1v = a12[:, 0:1]                                          # (N, 1) column
        a2v = a12[:, 1:2]                                          # (N, 1) column
        # a2v as a row: lane-broadcast the column then one full-tile XLU transpose.
        a2row = jnp.broadcast_to(a2v, (N, N)).T                    # a2row[i, j] = a2v[j]

        # e = (a1v + a2v^T) / n_head
        e = (a1v + a2row) / n_head_f

        # ---- batch validity mask (rows < n_src[b], cols < ns_tgt[b]) + relu ----
        row = lax.broadcasted_iota(jnp.int32, (N, N), 0)
        col = lax.broadcasted_iota(jnp.int32, (N, N), 1)
        mask = jnp.logical_and(row < ns, col < nt)
        att = jnp.where(mask, jnp.maximum(e, 0.0), 0.0)

        # ---- per-batch link_num / scale / k (float32, mirroring the torch code) ----
        ns_f = ns.astype(jnp.float32)
        link_num = jnp.minimum(ns_f * ratio_f, ns_f * 1.0)
        scale = 1.0 / link_num
        k = link_num.astype(jnp.int32)        # truncation == link_num.long() for >= 0

        # ---- per-row top-k via iterative k-th-largest threshold (dynamic k) ----
        # After k passes thr[i] is the k-th largest value of row i; rows with fewer
        # than k positive entries end at thr <= 0, so the (att > 0) gate keeps all
        # positives — exactly torch.topk + scatter + (>0) label for tie-free values.
        def body(_, carry):
            work, _thr = carry
            cur = jnp.max(work, axis=-1, keepdims=True)            # (N, 1)
            work = jnp.where(work == cur, -jnp.inf, work)
            return work, cur

        init = (att, jnp.full((N, 1), jnp.inf, dtype=jnp.float32))
        _, thr = lax.fori_loop(0, k, body, init)

        keep = jnp.logical_and(att >= thr, att > 0.0).astype(jnp.float32)
        btopk = att * keep                    # == top-k values scattered back
        topk = btopk * keep.T                 # symmetric gating: btopk * label_m^T

        out_ref[0] = scale * jnp.tanh(topk)

    return kernel


# ----------------------------- Wrapper -----------------------------
def gat_layer_forward(emb1, n_src, ns_tgt, W_t, a1, a2, *, n_head, layer_id):
    """Pallas implementation of GraphAttentionLayer.forward (single fused call)."""
    B, N, Fin = emb1.shape

    # Fold the attention projections into the weight: Wa = W^T @ [a1 | a2]  -> (Fin, 2).
    # HIGHEST precision keeps the fold at f32 accuracy (tiny, constant-foldable op).
    Wa = jnp.dot(W_t, jnp.concatenate([a1, a2], axis=1),
                 precision=jax.lax.Precision.HIGHEST).astype(jnp.float32)

    # ratio = max(0.4 / 2**layer_id, 0.1)  (static given layer_id)
    ratio = float(np.maximum(np.float32(0.4) / np.float32(2.0) ** np.int32(layer_id),
                             np.float32(0.1)))

    attn = pl.pallas_call(
        _make_fused_kernel(n_head, ratio),
        out_shape=jax.ShapeDtypeStruct((B, N, N), jnp.float32),
        grid_spec=pltpu.PrefetchScalarGridSpec(
            num_scalar_prefetch=2,
            grid=(B,),
            in_specs=[pl.BlockSpec((1, N, Fin), lambda b, ns, nt: (b, 0, 0)),
                      pl.BlockSpec((Fin, 2), lambda b, ns, nt: (0, 0))],
            out_specs=pl.BlockSpec((1, N, N), lambda b, ns, nt: (b, 0, 0)),
        ),
        compiler_params=pltpu.CompilerParams(dimension_semantics=("parallel",)),
    )(n_src.astype(jnp.int32), ns_tgt.astype(jnp.int32), emb1, Wa)

    return attn


# ----------------------------- NumPy reference (torch semantics) -----------------------------
def _reference(emb1, n_src, ns_tgt, W_t, a1, a2, n_head, layer_id):
    emb1 = np.asarray(emb1, np.float32)
    W_t, a1, a2 = np.asarray(W_t), np.asarray(a1), np.asarray(a2)
    n_src = np.asarray(n_src)
    ns_tgt = np.asarray(ns_tgt)
    h = emb1 @ W_t
    a1v = h @ a1
    a2v = h @ a2
    e = (a1v + np.transpose(a2v, (0, 2, 1))) / n_head
    B, N, _ = e.shape
    mask = np.zeros((B, N, N), np.float32)
    for b in range(B):
        mask[b, :n_src[b], :ns_tgt[b]] = 1.0
    att = np.where(mask > 0, np.maximum(e, 0.0), 0.0).astype(np.float32)
    ratio = np.maximum(np.float32(0.4) / np.float32(2.0) ** np.int32(layer_id),
                       np.float32(0.1))
    out = np.zeros_like(att)
    for b in range(B):
        link_num = np.float32(min(np.float32(n_src[b]) * ratio, np.float32(n_src[b])))
        k = int(link_num)
        scale = np.float32(1.0) / link_num
        batt = att[b]
        btopk = np.zeros_like(batt)
        if k > 0:
            idx = np.argsort(-batt, axis=-1, kind="stable")[:, :k]
            vals = np.take_along_axis(batt, idx, axis=-1)
            np.put_along_axis(btopk, idx, vals, axis=-1)
        label = (btopk > 0).astype(np.float32)
        out[b] = scale * np.tanh(btopk * label.T)
    return out


# ----------------------------- Main -----------------------------
if __name__ == "__main__":
    # Module hyper-parameters (dropout/alpha/concat are unused in forward()).
    in_features = 8
    out_features = 8
    n_head = 2
    layer_id = 1

    B, N = 2, 16  # batch, nodes (max(n_src) == max(ns_tgt) == N as the torch code assumes)

    key = jax.random.PRNGKey(0)
    k_emb, k_w, k_a1, k_a2 = jax.random.split(key, 4)

    # Deterministic xavier_uniform-style init (gain=1.414), same shapes as the module.
    w_bound = 1.414 * np.sqrt(6.0 / (in_features + out_features))
    a_bound = 1.414 * np.sqrt(6.0 / (out_features + 1))
    W_t = jax.random.uniform(k_w, (in_features, out_features), jnp.float32,
                             -w_bound, w_bound)   # == W.weight.T
    a1 = jax.random.uniform(k_a1, (out_features, 1), jnp.float32, -a_bound, a_bound)
    a2 = jax.random.uniform(k_a2, (out_features, 1), jnp.float32, -a_bound, a_bound)

    emb1 = jax.random.normal(k_emb, (B, N, in_features), jnp.float32)
    n_src = jnp.array([16, 10], dtype=jnp.int32)
    ns_tgt = jnp.array([16, 12], dtype=jnp.int32)

    out = gat_layer_forward(emb1, n_src, ns_tgt, W_t, a1, a2,
                            n_head=n_head, layer_id=layer_id)
    out = jax.block_until_ready(out)

    ref = _reference(emb1, n_src, ns_tgt, W_t, a1, a2, n_head, layer_id)
    np.testing.assert_allclose(np.asarray(out), ref, rtol=1e-4, atol=1e-5)

    print("KERNEL_OK")
</pallas_src>

<mosaic_0001>
module attributes {stable_mosaic.version = 11 : i64} {
  func.func @kernel(%arg0: i32, %arg1: memref<2xi32, #tpu.memory_space<smem>>, %arg2: memref<2xi32, #tpu.memory_space<smem>>, %arg3: memref<1x16x8xf32, #tpu.memory_space<vmem>>, %arg4: memref<8x2xf32, #tpu.memory_space<vmem>>, %arg5: memref<1x16x16xf32, #tpu.memory_space<vmem>>) attributes {dimension_semantics = [#tpu.dimension_semantics<parallel>], iteration_bounds = array<i64: 2>, scalar_prefetch = 2 : i64, scratch_operands = 0 : i64, tpu.core_type = #tpu.core_type<tc>, window_params = [{transform_indices = @transform_0, window_bounds = array<i64: 1, 16, 8>}, {pipeline_mode = #tpu.pipeline_mode<synchronous>, transform_indices = @transform_1, window_bounds = array<i64: 8, 2>}, {transform_indices = @transform_2, window_bounds = array<i64: 1, 16, 16>}]} {
    %0 = arith.index_cast %arg0 : i32 to index
    %1 = memref.load %arg1[%0] : memref<2xi32, #tpu.memory_space<smem>>
    %2 = arith.index_cast %arg0 : i32 to index
    %3 = memref.load %arg2[%2] : memref<2xi32, #tpu.memory_space<smem>>
    %c0 = arith.constant 0 : index
    %c0_0 = arith.constant 0 : index
    %c0_1 = arith.constant 0 : index
    %4 = vector.load %arg3[%c0, %c0_0, %c0_1] : memref<1x16x8xf32, #tpu.memory_space<vmem>>, vector<1x16x8xf32>
    %5 = vector.shape_cast %4 : vector<1x16x8xf32> to vector<16x8xf32>
    %c0_2 = arith.constant 0 : index
    %c0_3 = arith.constant 0 : index
    %6 = vector.load %arg4[%c0_2, %c0_3] : memref<8x2xf32, #tpu.memory_space<vmem>>, vector<8x2xf32>
    %cst = arith.constant dense<0.000000e+00> : vector<16x2xf32>
    %7 = tpu.matmul %5, %6, %cst {dimension_numbers = #tpu.dot_dimension_numbers<[1], [0], [0], [1], [0, 0, 1, 1], [], []>} : vector<16x8xf32>, vector<8x2xf32>, vector<16x2xf32> -> vector<16x2xf32>
    %8 = vector.extract_strided_slice %7 {offsets = [0, 0], sizes = [16, 1], strides = [1, 1]} : vector<16x2xf32> to vector<16x1xf32>
    %9 = vector.extract_strided_slice %7 {offsets = [0, 1], sizes = [16, 1], strides = [1, 1]} : vector<16x2xf32> to vector<16x1xf32>
    %10 = vector.shape_cast %9 : vector<16x1xf32> to vector<16x1xf32>
    %11 = vector.broadcast %10 : vector<16x1xf32> to vector<16x16xf32>
    %12 = tpu.transpose %11, [1, 0] : vector<16x16xf32> -> vector<16x16xf32>
    %13 = vector.broadcast %8 : vector<16x1xf32> to vector<16x16xf32>
    %14 = arith.addf %13, %12 : vector<16x16xf32>
    %cst_4 = arith.constant 2.000000e+00 : f32
    %15 = vector.broadcast %cst_4 : f32 to vector<16x16xf32>
    %16 = arith.divf %14, %15 : vector<16x16xf32>
    %17 = tpu.iota {dimensions = array<i32: 0>} : vector<16x16xi32>
    %18 = tpu.iota {dimensions = array<i32: 1>} : vector<16x16xi32>
    %19 = vector.broadcast %1 : i32 to vector<16x16xi32>
    %20 = arith.cmpi slt, %17, %19 : vector<16x16xi32>
    %21 = vector.broadcast %3 : i32 to vector<16x16xi32>
    %22 = arith.cmpi slt, %18, %21 : vector<16x16xi32>
    %23 = arith.andi %20, %22 : vector<16x16xi1>
    %cst_5 = arith.constant 0.000000e+00 : f32
    %24 = vector.broadcast %cst_5 : f32 to vector<16x16xf32>
    %25 = arith.maximumf %16, %24 : vector<16x16xf32>
    %cst_6 = arith.constant 0.000000e+00 : f32
    %26 = vector.broadcast %cst_6 : f32 to vector<16x16xf32>
    %27 = arith.select %23, %25, %26 : vector<16x16xi1>, vector<16x16xf32>
    %28 = arith.sitofp %1 : i32 to f32
    %cst_7 = arith.constant 2.000000e-01 : f32
    %29 = arith.mulf %28, %cst_7 : f32
    %cst_8 = arith.constant 1.000000e+00 : f32
    %30 = arith.mulf %28, %cst_8 : f32
    %31 = arith.minimumf %29, %30 : f32
    %cst_9 = arith.constant 1.000000e+00 : f32
    %32 = arith.divf %cst_9, %31 : f32
    %33 = arith.fptosi %31 : f32 to i32
    %cst_10 = arith.constant 0x7F800000 : f32
    %34 = vector.broadcast %cst_10 : f32 to vector<16x1xf32>
    %c0_i32 = arith.constant 0 : i32
    %35 = arith.subi %33, %c0_i32 : i32
    %36 = arith.addi %c0_i32, %35 : i32
    %c1_i32 = arith.constant 1 : i32
    %37:2 = scf.for %arg6 = %c0_i32 to %36 step %c1_i32 iter_args(%arg7 = %27, %arg8 = %34) -> (vector<16x16xf32>, vector<16x1xf32>)  : i32 {
      %cst_15 = arith.constant dense<0xFF800000> : vector<16xf32>
      %54 = vector.multi_reduction <maximumf>, %arg7, %cst_15 [1] : vector<16x16xf32> to vector<16xf32>
      %55 = vector.shape_cast %54 : vector<16xf32> to vector<16x1xf32>
      %56 = vector.broadcast %55 : vector<16x1xf32> to vector<16x16xf32>
      %57 = arith.cmpf oeq, %arg7, %56 : vector<16x16xf32>
      %cst_16 = arith.constant 0xFF800000 : f32
      %58 = vector.broadcast %cst_16 : f32 to vector<16x16xf32>
      %59 = arith.select %57, %58, %arg7 : vector<16x16xi1>, vector<16x16xf32>
      scf.yield %59, %55 : vector<16x16xf32>, vector<16x1xf32>
    }
    %38 = vector.broadcast %37#1 : vector<16x1xf32> to vector<16x16xf32>
    %39 = arith.cmpf oge, %27, %38 : vector<16x16xf32>
    %cst_11 = arith.constant 0.000000e+00 : f32
    %40 = vector.broadcast %cst_11 : f32 to vector<16x16xf32>
    %41 = arith.cmpf ogt, %27, %40 : vector<16x16xf32>
    %42 = arith.andi %39, %41 : vector<16x16xi1>
    %43 = arith.extui %42 : vector<16x16xi1> to vector<16x16xi32>
    %44 = arith.sitofp %43 : vector<16x16xi32> to vector<16x16xf32>
    %45 = arith.mulf %27, %44 : vector<16x16xf32>
    %46 = tpu.transpose %44, [1, 0] : vector<16x16xf32> -> vector<16x16xf32>
    %47 = arith.mulf %45, %46 : vector<16x16xf32>
    %48 = math.tanh %47 : vector<16x16xf32>
    %49 = vector.broadcast %32 : f32 to vector<16x16xf32>
    %50 = arith.mulf %49, %48 : vector<16x16xf32>
    %c0_12 = arith.constant 0 : index
    %c0_13 = arith.constant 0 : index
    %c0_14 = arith.constant 0 : index
    %51 = vector.load %arg5[%c0_12, %c0_13, %c0_14] : memref<1x16x16xf32, #tpu.memory_space<vmem>>, vector<1x16x16xf32>
    %52 = vector.shape_cast %51 : vector<1x16x16xf32> to vector<16x16xf32>
    %53 = vector.shape_cast %50 : vector<16x16xf32> to vector<1x16x16xf32>
    tpu.vector_store %arg5[%c0_12, %c0_13, %c0_14], %53 {strides = array<i32>} : memref<1x16x16xf32, #tpu.memory_space<vmem>>, vector<1x16x16xf32>,
    return
  }
  func.func @transform_0(%arg0: i32, %arg1: memref<2xi32, #tpu.memory_space<smem>>, %arg2: memref<2xi32, #tpu.memory_space<smem>>) -> (i32, i32, i32) {
    %c0_i32 = arith.constant 0 : i32
    %c0_i32_0 = arith.constant 0 : i32
    %c0_i32_1 = arith.constant 0 : i32
    return %arg0, %c0_i32, %c0_i32_0 : i32, i32, i32
  }
  func.func @transform_1(%arg0: i32, %arg1: memref<2xi32, #tpu.memory_space<smem>>, %arg2: memref<2xi32, #tpu.memory_space<smem>>) -> (i32, i32) {
    %c0_i32 = arith.constant 0 : i32
    %c0_i32_0 = arith.constant 0 : i32
    %c0_i32_1 = arith.constant 0 : i32
    return %c0_i32, %c0_i32_0 : i32, i32
  }
  func.func @transform_2(%arg0: i32, %arg1: memref<2xi32, #tpu.memory_space<smem>>, %arg2: memref<2xi32, #tpu.memory_space<smem>>) -> (i32, i32, i32) {
    %c0_i32 = arith.constant 0 : i32
    %c0_i32_0 = arith.constant 0 : i32
    %c0_i32_1 = arith.constant 0 : i32
    return %arg0, %c0_i32, %c0_i32_0 : i32, i32, i32
  }
}

</mosaic_0001>

<bundles_post_ra>
// kernel: tpu_custom_call.1
= control target key start
LH: loop header
LB: loop body
LE: loop exit
PB: predicated region body
PF: predicated region fallthrough
CT: control target
= control target key end

     0   :  { %s919_s0 = inlined_call_operand.vmem [shape: s32[2], index: 0, kind: input, shape index: {}]   ;;  %s920_s2 = inlined_call_operand.vmem [shape: f32[2,16,8], index: 2, kind: input, shape index: {}]   ;;  %s921_s3 = inlined_call_operand.vmem [shape: f32[8,2], index: 3, kind: input, shape index: {}]   ;;  %s922_s4 = inlined_call_operand.hbm [shape: f32[2,16,16], index: 4, kind: output, shape index: {}]   ;;  %s923_s1 = inlined_call_operand.vmem [shape: s32[2], index: 1, kind: input, shape index: {}]  }
   0x1   :  { %s9_s17 = sshll.u32 %s919_s0, 4  ;;  %s13_s20 = sshll.u32 %s923_s1, 4  ;;  %s10_s17 = int_to_ptr.vmem [resolvable:$true] %s9_s17  ;;  %s14_s20 = int_to_ptr.vmem [resolvable:$true] %s13_s20 }
   0x2   :  { %s616_s21 = scalar_lea.vmem %s10_s17, 16  ;;  %p621_p1 = scmp.lt.s32.totalorder %s10_s17, %s10_s17 }
   0x3   :  { %p617_p0 = scmp.ne.s32.totalorder %s10_s17, %s616_s21  ;;  %p622_p2 = scmp.lt.s32.totalorder %s616_s21, %s616_s21 }
   0x5   :  { %p623_p3 = por %p622_p2, %p621_p1 }
   0x7   :  { %p624_p4 = pnand %p623_p3, %p617_p0 }
   0x9   :  { %627 = shalt.err (!%p624_p4)  }
   0xa   :  { %s746_s22 = smov [#allocation3]   ;;  %s628_s23 = scalar_lea.vmem %s14_s20, 16 }
   0xb   :  { %12 = dma.vmem_to_smem %s10_s17, 16, %s746_s22, [#allocation2] }
   0xc   :  { %p629_p5 = scmp.ne.s32.totalorder %s14_s20, %s628_s23  ;;  %p633_p6 = scmp.lt.s32.totalorder %s14_s20, %s14_s20 }
   0xd   :  { %p634_p7 = scmp.lt.s32.totalorder %s628_s23, %s628_s23 }
   0xf   :  { %p635_p8 = por %p634_p7, %p633_p6 }
  0x11   :  { %p636_p9 = pnand %p635_p8, %p629_p5 }
  0x13   :  { %639 = shalt.err (!%p636_p9)  }
  0x14   :  { %s747_s0 = smov [#allocation4]  }
  0x15   :  { %16 = dma.vmem_to_smem %s14_s20, 16, %s747_s0, [#allocation2] }
  0x16   :  { %704 = dma.done.wait [#allocation2], 32 }
  0x17   :  { %705 = vsyncadd [#allocation2], 4294967264 }
  0x18   :  { %18 = sfence }
  0x19   :  { %19 = vsyncpa [#allocation6], 0 }
  0x1a   :  { %21 = vsyncpa [#allocation6 + $0x1], 0  ;;  %s785_s1 = smov 0   ;;  %s787_s24 = smov 0  }
  0x1b   :  { %s789_s25 = smov 0   ;;  %s791_s26 = smov 0  }
  0x1c LB: > { %s806_s27 = sadd.s32 4294967295, %s724_s26   ;;  %s487_s28 = sadd.s32 4294967294, %s724_s26   ;;  %s724_s26 = sphi %s791_s26, %s929_s26   ;;  %s720_s25 = sphi %s789_s25, %s928_s25   ;;  %s716_s24 = sphi %s787_s24, %s927_s24   ;;  %s712_s1 = sphi %s785_s1, %s926_s1  }
  0x1d   : > { %s810_s29 = sadd.s32 1, %s724_s26   ;;  %s81_s30 = sadd.s32 1, %s720_s25 }
  0x1e   : > { %s78_s5 = ssub.s32 %s724_s26, %s810_s29  ;;  %p91_p10 = scmp.ne.s32.totalorder %s720_s25, %s716_s24 }
  0x1f   : > { %p79_p11 = scmp.eq.s32.totalorder %s78_s5, 0  ;;  %p92_p12 = scmp.eq.s32.totalorder %s806_s27, 1 }
  0x20   : > { %p97_p13 = scmp.ne.s32.totalorder %s716_s24, %s712_s1  ;;  %p98_p0 = scmp.eq.s32.totalorder %s487_s28, 1 }
  0x21   : > { %s821_s6 = scalar_select %p79_p11, %s720_s25, %s81_s30  }
  0x22   : > { %p823_p1 = por %p92_p12, %p91_p10  ;;  %p827_p2 = por %p98_p0, %p97_p13 }
  0x23   : > { %p490_p3 = scmp.ge.s32.totalorder %s724_s26, 1  ;;  %p127_p4 = scmp.lt.s32.totalorder %s724_s26, 3 }
  0x25   : > { %p128_p5 = pnand %p490_p3, %p127_p4 }
  0x26   : > { %s146_s9 = sand.u32 (!%p128_p5), 1, %s716_s24   ;;  %v158_v0 = vld [vmem:[%s921_s3] sm:$0xff] (!%p128_p5)  ;;  %p149_p6 = scmp.lt.s32.totalorder (!%p128_p5), %s806_s27, 1  ;;  %vm159_vm0 = vcmask (!%p128_p5), 64512   ;;  %v748_v3 = vmov (!%p128_p5), 0   ;;  %v749_v4 = vmov (!%p128_p5), 1   ;;  %v296_v11 = vlaneseq (!%p128_p5) }
  0x27   : > { %131 = sbr.rel (%p128_p5) target bundleno = 850 (0x352), region = 28  ;;  %s840_s12 = sshll.u32 (!%p128_p5), %s146_s9, 4  ;;  %509 = vmatprep.subr.mxu0 (!%p128_p5), %v158_v0  ;;  %608 = vset.pattern.permute.xlu1 (!%p128_p5), %v748_v3  ;;  %v738_v29 = vmov (!%p128_p5), inf   ;;  %v742_v30 = vmov (!%p128_p5), inf  }
  0x28   : > { %510 = vmatpush3.msra.mxu0 (!%p128_p5), %v158_v0  ;;  %607 = vset.pattern.permute.xlu0 (!%p128_p5), %v749_v4  ;;  %s847_s18 = sld [smem:[#allocation3 + %s806_s27]] (!%p128_p5)  ;;  %v297_v12 = vshrl.u32 (!%p128_p5), %v296_v11, 7  ;;  %v300_v13 = vand.u32 (!%p128_p5), 127, %v296_v11  ;;  %s858_s5 = scalar_lea.vmem (!%p128_p5), [#allocation5], %s840_s12 }
  0x29   : > { %s155_s30 = sld [smem:[#allocation4 + %s806_s27]] (!%p128_p5) }
  0x2a   : > { %v298_v19 = vadd.s32 (!%p128_p5), 8, %v297_v12 }
  0x2e   : > { %s150_s13 = scalar_select %p149_p6, %s806_s27, 1  ;;  %v301_v15 = vstv %s847_s18 }
  0x2f   : > { %s312_s19 = scvt.s32.f32 %s847_s18  ;;  %v304_v16 = vstv %s155_s30  ;;  %vm302_vm1 = vcmp.lt.s32.totalorder %v297_v12, %v301_v15  ;;  %vm303_vm4 = vcmp.lt.s32.totalorder %v298_v19, %v301_v15 }
  0x30   : > { %s504_s14 = sshll.u32 %s150_s13, 4  ;;  %vm305_vm2 = vcmp.lt.s32.totalorder %v300_v13, %v304_v16 }
  0x31   : > { %s153_s17 = scalar_lea.vmem %s920_s2, %s504_s14  ;;  %s313_s20 = smul.f32 0.2, %s312_s19  ;;  %vm306_vm3 = vmand %vm302_vm1, %vm305_vm2 }
  0x32   : > { %v156_v1 = vld [vmem:[%s153_s17] sm:$0xff]  ;;  %v157_v2 = vld [vmem:[%s153_s17 + $0x8] sm:$0xff]  ;;  %vm307_vm5 = vmand %vm303_vm4, %vm305_vm2 }
  0x33   : > { %511 = vmatprep.mubr.msk.f32.mxu0 %vm159_vm0, %v156_v1  ;;  %s314_s21 = smin.f32 %s313_s20, %s312_s19 }
  0x34   : > { %512 = vmatmul.mubr.msk.f32.vlgmr.msra.gmra.mrb[0].mxu0 %vm159_vm0, %v157_v2  ;;  %v315_v7 = vstv %s314_s21  ;;  %p516_p7 = scmp.lt.s32.totalorder %s314_s21, 0  ;;  %s517_s22 = sceil.f32 %s314_s21 }
  0x35   : > { %610 = vrcp.f32 %v315_v7  ;;  %s518_s23 = sfloor.f32 %s314_s21 }
  0x36   : > { %s931_s22 = smov (!%p516_p7, %s517_s22), %s518_s23 }
  0x37   : > { %s520_s0 = scvt.f32.s32 %s931_s22 }
  0x39   : > { %p496_p8 = scmp.le.s32.totalorder %s520_s0, 0 }
  0x3a   : > { %s734_s10 = smov (!%p496_p8), 0  }
  0x3f   : > { %v611_v8 = vpop.eup %610 }
  0x40   : > { %514 = vpush %v611_v8 }
  0x71   : > { %s853_s28 = spop %514 }
 0x107   : > { %v513_v5 = vpop.f32.mrb[0].mxu0 }
 0x108   : > { %v232_v6 = vpop.f32.mrb[1].mxu0 }
 0x109   : > { %284 = vperm.xlu1 %608, %v232_v6   ;;  %243 = vperm.xlu0 %607, %v232_v6  }
 0x10d   : > { %288 = vperm.xlu1 %608, %v513_v5   ;;  %248 = vperm.xlu0 %607, %v513_v5  }
 0x188   : > { %v244_v9 = vpop.permute.xlu0 %243  ;;  %v285_v14 = vpop.permute.xlu1 %284 }
 0x189   : > { %251 = vxpose.xlu0.b32.start [1/2] (short) (narrow) %v244_v9, 16 }
 0x18c   : > { %v249_v10 = vpop.permute.xlu0 %248  ;;  %v289_v21 = vpop.permute.xlu1 %288 }
 0x18d   : > { %252 = vxpose.xlu0.b32.end [2/2] (short) (narrow) %v249_v10, 16 }
 0x1b6   : > { %609 = vset.pattern.permute.xlu0 %v748_v3 }
 0x209   : > { %v267_v17 = vpop.trf.xlu0 }
 0x20a   : > { %v291_v18 = vadd.f32 %v285_v14, %v267_v17 }
 0x20c   : > { %v294_v20 = vmul.f32 0.5, %v291_v18 }
 0x20d   : > { %v268_v22 = vpop.trf.xlu0 }
 0x20e   : > { %v308_v23 = vmax.f32 %v294_v20, 0.0  ;;  %v292_v24 = vadd.f32 %v289_v21, %v268_v22  ;;  %455 = sbr.rel (%p496_p8) target bundleno = 684 (0x2ac), region = 64 }
 0x210   : > { %v310_v25 = vsel %vm306_vm3, %v308_v23, 0.0   ;;  %v295_v26 = vmul.f32 0.5, %v292_v24 }
 0x211   : > { %v730_v32 = vmov (!%p496_p8), %v310_v25  }
 0x212   : > { %v309_v27 = vmax.f32 %v295_v26, 0.0 }
 0x214   : > { %v311_v28 = vsel %vm307_vm5, %v309_v27, 0.0  }
 0x215   : > { %v726_v31 = vmov %v311_v28  }
 0x216 LB: >> { %vm329_vm6 = vcmask 130048   ;;  %s322_s10 = sadd.s32 1, %s736_s10   ;;  %s736_s10 = sphi %s734_s10, %s322_s10   ;;  %v732_v32 = vphi %v730_v32, %v338_v32   ;;  %v728_v31 = vphi %v726_v31, %v339_v31  }
 0x217   : >> { %v330_v33 = vsel %vm329_vm6, %v732_v32, -inf  ;;  %v333_v34 = vsel %vm329_vm6, %v728_v31, -inf  ;;  %p321_p9 = scmp.ge.s32.totalorder %s322_s10, %s520_s0 }
 0x218   : >> { %331 = vmax.xlane.f32.xlu0 %v330_v33 }
 0x21c   : >> { %334 = vmax.xlane.f32.xlu0 %v333_v34 }
 0x2a5   : >> { %v332_v30 = vpop.xlane.xlu0 %331   ;;  %324 = sbr.rel (!%p321_p9) target bundleno = 534 (0x216), region = 70 }
 0x2a6   : >> { %vm336_vm7 = vcmp.eq.f32.partialorder %v732_v32, %v332_v30 }
 0x2a7   : >> { %v338_v32 = vsel %vm336_vm7, -inf, %v732_v32  }
 0x2a9   : >> { %v335_v29 = vpop.xlane.xlu0 %334  }
 0x2aa   : >> { %vm337_vm8 = vcmp.eq.f32.partialorder %v728_v31, %v335_v29 }
 0x2ab   : >> { %v339_v31 = vsel %vm337_vm8, -inf, %v728_v31  }
 0x2ac PF: > { %vm340_vm9 = vcmp.ge.f32.partialorder %v310_v25, %v744_v30  ;;  %vm342_vm10 = vcmp.gt.f32.partialorder %v310_v25, 0.0  ;;  %vm341_vm11 = vcmp.ge.f32.partialorder %v311_v28, %v740_v29  ;;  %vm343_vm12 = vcmp.gt.f32.partialorder %v311_v28, 0.0  ;;  %s505_s11 = sshll.u32 %s806_s27, 8  ;;  %s408_s12 = sshll.u32 %s858_s5, 4  ;;  %v744_v30 = vphi %v742_v30, %v332_v30   ;;  %v740_v29 = vphi %v738_v29, %v335_v29   ;;  %s873_s12 = int_to_ptr.vmem [resolvable:$true] %s408_s12 }
 0x2ad   : > { %vm344_vm13 = vmand %vm340_vm9, %vm342_vm10  ;;  %v750_v35 = vmov 0.0   ;;  %v388_v44 = vstv %s853_s28  ;;  %vm391_vm15 = vcmask 130048   ;;  %s871_s15 = scalar_lea.hbm %s922_s4, %s505_s11  ;;  %s878_s16 = scalar_lea.sflag [#allocation6], %s146_s9 }
 0x2ae   : > { %v497_v36 = vsel %vm344_vm13, 1.0, %v750_v35  ;;  %vm345_vm14 = vmand %vm341_vm11, %vm343_vm12  ;;  %s640_s17 = scalar_lea.vmem %s873_s12, 256  ;;  %s751_s27 = smov [#allocation5]  }
 0x2af   : > { %352 = vxpose.xlu0.b32.start [1/2] (short) (narrow) %v497_v36, 16  ;;  %v498_v37 = vsel %vm345_vm14, 1.0, %v750_v35  ;;  %v350_v38 = vmul.f32 %v497_v36, %v310_v25  ;;  %p641_p10 = scmp.ne.s32.totalorder %s873_s12, %s640_s17  ;;  %s644_s18 = sshll.u32 %s751_s27, 4  ;;  %s645_s18 = int_to_ptr.vmem [resolvable:$false] %s644_s18 }
 0x2b0   : > { %v351_v40 = vmul.f32 %v498_v37, %v311_v28  ;;  %s646_s19 = scalar_lea.vmem %s645_s18, 512  ;;  %p647_p13 = scmp.lt.s32.totalorder %s873_s12, %s645_s18 }
 0x2b1   : > { %p642_p11 = pnand %p641_p10, %p823_p1  ;;  %p648_p0 = scmp.lt.s32.totalorder %s646_s19, %s640_s17 }
 0x2b3   : > { %353 = vxpose.xlu0.b32.end [2/2] (short) (narrow) %v498_v37, 16  ;;  %p643_p12 = pneg %p642_p11  ;;  %p649_p3 = por %p648_p0, %p647_p13 }
 0x2b5   : > { %p650_p4 = pnand %p649_p3, %p643_p12 }
 0x32f   : > { %v368_v39 = vpop.trf.xlu0 }
 0x330   : > { %v384_v41 = vmul.f32 %v368_v39, %v350_v38 }
 0x332   : > { %612 = vtanh.f32 %v384_v41 }
 0x333   : > { %v369_v42 = vpop.trf.xlu0 }
 0x334   : > { %v385_v43 = vmul.f32 %v369_v42, %v351_v40 }
 0x336   : > { %614 = vtanh.f32 %v385_v43 }
 0x33c   : > { %v613_v45 = vpop.eup %612 }
 0x33d   : > { %v389_v46 = vmul.f32 %v613_v45, %v388_v44 }
 0x33f   : > { %392 = vst.msk [vmem:[%s858_s5] sm:$0xff] %vm391_vm15, %v389_v46 }
 0x340   : > { %v615_v47 = vpop.eup %614 }
 0x341   : > { %v390_v48 = vmul.f32 %v615_v47, %v388_v44 }
 0x343   : > { %393 = vst.msk [vmem:[%s858_s5 + $0x8] sm:$0xff] %vm391_vm15, %v390_v48 }
 0x344   : > { %653 = shalt.err (!%p650_p4)
}
 0x345   : > { %s654_s9 = scalar_lea.hbm %s871_s15, 256  ;;  %s658_s22 = scalar_lea.hbm %s922_s4, 512 }
 0x346   : > { %p655_p5 = scmp.ne.s32.totalorder %s871_s15, %s654_s9  ;;  %p659_p8 = scmp.lt.u32.totalorder %s871_s15, %s922_s4 }
 0x347   : > { %p660_p9 = scmp.lt.u32.totalorder %s658_s22, %s654_s9  ;;  %p662_p11 = scmp.lt.u32.totalorder %s654_s9, %s871_s15 }
 0x348   : > { %p656_p6 = pnand %p655_p5, %p823_p1 }
 0x349   : > { %p661_p10 = por %p660_p9, %p659_p8 }
 0x34a   : > { %p657_p7 = pneg %p656_p6 }
 0x34b   : > { %p663_p12 = por %p662_p11, %p661_p10 }
 0x34d   : > { %p664_p13 = pnand %p663_p12, %p657_p7 }
 0x34f   : > { %667 = shalt.err (!%p664_p13)
}
 0x350   : > { %s752_s28 = smov 128   ;;  %s753_s30 = smov 8  }
 0x351   : > { %521 = dma.vmem_to_hbm [thread:$0]  (%p823_p1), %s873_s12, 256, %s871_s15, %s878_s16, %s752_s28, %s752_s28, %s753_s30  }
 0x352 PF: > { %p527_p0 = scmp.ge.s32.totalorder %s724_s26, 2  ;;  %s423_s5 = sand.u32 1, %s712_s1  }
 0x353   : > { %s424_s10 = scalar_lea.sflag [#allocation6], %s423_s5 }
 0x354   : > { %p524_p3 = pnand %p527_p0, %p827_p2 }
 0x356   : > { %707 = dma.done.wait (!%p524_p3), %s424_s10, 256  }
 0x357   : > { %709 = vsyncadd (!%p524_p3), %s424_s10, 4294967040  ;;  %p24_p4 = scmp.ge.s32.totalorder %s810_s29, 4   ;;  %s926_s1 = smov %s716_s24 }
 0x358   : > { %s927_s24 = smov %s720_s25  ;;  %s928_s25 = smov %s821_s6 }
 0x359   : > { %s929_s26 = smov %s810_s29  ;;  %26 = sbr.rel (!%p24_p4) target bundleno = 28 (0x1c), region = 81 }
 0x360   :  { %429 = vsyncpa [#allocation6], 1 }
 0x361   :  { %431 = vsyncpa [#allocation6 + $0x1], 1 }

</bundles_post_ra>
